<compile_context>
chip_gen: v7x
topology: tpu7x:2x2x1
jax: 0.10.0
libtpu: 0.0.40
codegen_flags: <defaults>
</compile_context>

<pallas_src>
from typing import Tuple

import jax
import jax.numpy as jnp
from jax.experimental import pallas as pl
from jax.experimental.pallas import tpu as pltpu


def _pick_tile(total: int, preferred: int, quantum: int) -> int:
    """Largest tile <= `preferred` that is a multiple of `quantum` and evenly
    divides `total`. Falls back to the full extent (always a legal block)."""
    if total <= preferred:
        return total
    t = (preferred // quantum) * quantum
    while t >= quantum:
        if total % t == 0:
            return t
        t -= quantum
    return total


# ---------------------------------------------------------------------------
# Kernel 1: adaLN modulation  (SiLU -> Linear), tiled over the output columns.
# ---------------------------------------------------------------------------
def _adaln_kernel(vec_ref, w_ref, b_ref, out_ref):
    v = vec_ref[...].astype(jnp.float32)
    silu = v * jax.nn.sigmoid(v)                               # VPU + EUP
    acc = jnp.dot(silu.astype(w_ref.dtype), w_ref[...],
                  preferred_element_type=jnp.float32)          # MXU, f32 accum
    out_ref[...] = (acc + b_ref[...].astype(jnp.float32)).astype(out_ref.dtype)


# ---------------------------------------------------------------------------
# Kernel 2: fused LayerNorm (no affine) + adaLN modulate + final Linear.
# grid = (b, i over seq tiles, j over output-column tiles); j is innermost.
# ---------------------------------------------------------------------------
def _make_last_layer_kernel(eps: float):
    def kernel(x_ref, shift_ref, scale_ref, w_ref, b_ref, o_ref, xmod_ref):
        b = pl.program_id(0)

        # Compute LayerNorm + modulation once per (b, i); reuse across all j.
        @pl.when(pl.program_id(2) == 0)
        def _():
            xv = x_ref[0].astype(jnp.float32)                  # (TM, D)
            mu = jnp.mean(xv, axis=-1, keepdims=True)
            xc = xv - mu
            var = jnp.mean(xc * xc, axis=-1, keepdims=True)
            xn = xc * jax.lax.rsqrt(var + eps)
            sh = shift_ref[pl.ds(b, 1), :].astype(jnp.float32)  # (1, D)
            sc = scale_ref[pl.ds(b, 1), :].astype(jnp.float32)  # (1, D)
            xmod_ref[...] = (1.0 + sc) * xn + sh

        acc = jnp.dot(xmod_ref[...].astype(w_ref.dtype), w_ref[...],
                      preferred_element_type=jnp.float32)       # MXU, f32 accum
        o_ref[0] = (acc + b_ref[...].astype(jnp.float32)).astype(o_ref.dtype)

    return kernel


def last_layer_forward(x: jax.Array,
                       vec: jax.Array,
                       w_mod: jax.Array,
                       b_mod: jax.Array,
                       w_out: jax.Array,
                       b_out: jax.Array,
                       *,
                       eps: float = 1e-6) -> jax.Array:
    """
    x:     [B, S, D]           (tokens)
    vec:   [B, D]              (conditioning vector)
    w_mod: [D, 2*D]            (transposed vs torch's [2D, D])
    b_mod: [2*D]
    w_out: [D, N_out]          (transposed vs torch's [N_out, D]); N_out = p*p*C
    b_out: [N_out]
    returns [B, S, N_out]
    """
    B, S, D = x.shape
    out2 = w_mod.shape[1]
    n_out = w_out.shape[1]
    assert vec.shape == (B, D)
    assert out2 == 2 * D
    itemsize = lambda a: int(jnp.dtype(a.dtype).itemsize)

    # ---- adaLN modulation: [B, 2D] = silu(vec) @ w_mod + b_mod ------------
    tnm = _pick_tile(out2, 1024, 128)
    mod = pl.pallas_call(
        _adaln_kernel,
        out_shape=jax.ShapeDtypeStruct((B, out2), vec.dtype),
        grid_spec=pltpu.PrefetchScalarGridSpec(
            num_scalar_prefetch=0,
            grid=(out2 // tnm,),
            in_specs=[
                pl.BlockSpec((B, D), lambda j: (0, 0)),       # vec resident
                pl.BlockSpec((D, tnm), lambda j: (0, j)),     # weight: pipelined
                pl.BlockSpec((1, tnm), lambda j: (0, j)),     # bias
            ],
            out_specs=pl.BlockSpec((B, tnm), lambda j: (0, j)),
        ),
        compiler_params=pltpu.CompilerParams(
            dimension_semantics=("parallel",)),
        cost_estimate=pl.CostEstimate(
            flops=2 * B * D * out2,
            transcendentals=B * D,
            bytes_accessed=int(vec.size) * itemsize(vec)
            + int(w_mod.size) * itemsize(w_mod)
            + B * out2 * itemsize(vec)),
    )(vec, w_mod, b_mod.reshape(1, out2))

    shift = mod[:, :D]     # tiny [B, D] slices (pure glue)
    scale = mod[:, D:]

    # ---- fused LayerNorm + modulate + final Linear ------------------------
    tm = _pick_tile(S, 256, 8)        # sequence tile (sublane quantum 8)
    tn = _pick_tile(n_out, 512, 128)  # output-column tile (lane quantum 128)
    n_seq_tiles = S // tm
    n_col_tiles = n_out // tn

    out = pl.pallas_call(
        _make_last_layer_kernel(eps),
        out_shape=jax.ShapeDtypeStruct((B, S, n_out), x.dtype),
        grid_spec=pltpu.PrefetchScalarGridSpec(
            num_scalar_prefetch=0,
            grid=(B, n_seq_tiles, n_col_tiles),
            in_specs=[
                pl.BlockSpec((1, tm, D), lambda b, i, j: (b, i, 0)),  # x tile
                pl.BlockSpec((B, D), lambda b, i, j: (0, 0)),         # shift
                pl.BlockSpec((B, D), lambda b, i, j: (0, 0)),         # scale
                pl.BlockSpec((D, tn), lambda b, i, j: (0, j)),        # W_out tile
                pl.BlockSpec((1, tn), lambda b, i, j: (0, j)),        # b_out tile
            ],
            out_specs=pl.BlockSpec((1, tm, tn), lambda b, i, j: (b, i, j)),
            scratch_shapes=[pltpu.VMEM((tm, D), jnp.float32)],        # norm+mod cache
        ),
        compiler_params=pltpu.CompilerParams(
            dimension_semantics=("parallel", "parallel", "arbitrary")),
        cost_estimate=pl.CostEstimate(
            flops=2 * B * S * D * n_out + 10 * B * S * D,
            transcendentals=B * S,
            bytes_accessed=int(x.size) * itemsize(x)
            + int(w_out.size) * itemsize(w_out) * B * n_seq_tiles
            + B * S * n_out * itemsize(x)),
    )(x, shift, scale, w_out, b_out.reshape(1, n_out))

    return out


# ---------------------------------------------------------------------------
# Pure-JAX reference (matches the PyTorch LastLayer.forward)
# ---------------------------------------------------------------------------
def _reference(x, vec, w_mod, b_mod, w_out, b_out, eps=1e-6):
    v = vec.astype(jnp.float32)
    silu = v * jax.nn.sigmoid(v)
    mod = jnp.dot(silu, w_mod.astype(jnp.float32),
                  precision=jax.lax.Precision.HIGHEST) + b_mod.astype(jnp.float32)
    D = x.shape[-1]
    shift, scale = mod[:, :D], mod[:, D:]
    xf = x.astype(jnp.float32)
    mu = jnp.mean(xf, axis=-1, keepdims=True)
    var = jnp.mean((xf - mu) ** 2, axis=-1, keepdims=True)
    xn = (xf - mu) * jax.lax.rsqrt(var + eps)
    xm = (1.0 + scale[:, None, :]) * xn + shift[:, None, :]
    return jnp.dot(xm, w_out.astype(jnp.float32),
                   precision=jax.lax.Precision.HIGHEST) + b_out.astype(jnp.float32)


if __name__ == "__main__":
    key = jax.random.PRNGKey(0)
    B, S, hidden = 2, 8, 32
    patch_size, out_channels = 2, 4
    n_out = patch_size * patch_size * out_channels

    ks = jax.random.split(key, 6)
    x = jax.random.normal(ks[0], (B, S, hidden), dtype=jnp.float32)
    vec = jax.random.normal(ks[1], (B, hidden), dtype=jnp.float32)
    # Deterministic synthetic parameters (weights stored as [in, out]).
    w_mod = jax.random.normal(ks[2], (hidden, 2 * hidden), dtype=jnp.float32) * 0.02
    b_mod = jax.random.normal(ks[3], (2 * hidden,), dtype=jnp.float32) * 0.02
    w_out = jax.random.normal(ks[4], (hidden, n_out), dtype=jnp.float32) * 0.02
    b_out = jax.random.normal(ks[5], (n_out,), dtype=jnp.float32) * 0.02

    out = last_layer_forward(x, vec, w_mod, b_mod, w_out, b_out)
    jax.block_until_ready(out)

    ref = _reference(x, vec, w_mod, b_mod, w_out, b_out)
    assert out.shape == (B, S, n_out), out.shape
    assert jnp.allclose(out.astype(jnp.float32), ref, atol=2e-3, rtol=2e-3), \
        "mismatch vs reference"

    print("KERNEL_OK")
</pallas_src>

<mosaic_0001>
module attributes {stable_mosaic.version = 11 : i64} {
  func.func @_adaln_kernel(%arg0: i32, %arg1: memref<2x32xf32, #tpu.memory_space<vmem>>, %arg2: memref<32x64xf32, #tpu.memory_space<vmem>>, %arg3: memref<1x64xf32, #tpu.memory_space<vmem>>, %arg4: memref<2x64xf32, #tpu.memory_space<vmem>>) attributes {dimension_semantics = [#tpu.dimension_semantics<parallel>], iteration_bounds = array<i64: 1>, scalar_prefetch = 0 : i64, scratch_operands = 0 : i64, tpu.core_type = #tpu.core_type<tc>, window_params = [{pipeline_mode = #tpu.pipeline_mode<synchronous>, transform_indices = @transform_0, window_bounds = array<i64: 2, 32>}, {transform_indices = @transform_1, window_bounds = array<i64: 32, 64>}, {transform_indices = @transform_2, window_bounds = array<i64: 1, 64>}, {transform_indices = @transform_3, window_bounds = array<i64: 2, 64>}]} {
    %c0 = arith.constant 0 : index
    %c0_0 = arith.constant 0 : index
    %0 = vector.load %arg1[%c0, %c0_0] : memref<2x32xf32, #tpu.memory_space<vmem>>, vector<2x32xf32>
    %1 = arith.negf %0 : vector<2x32xf32>
    %2 = math.exp %1 : vector<2x32xf32>
    %cst = arith.constant 1.000000e+00 : f32
    %3 = vector.broadcast %cst : f32 to vector<2x32xf32>
    %4 = arith.addf %3, %2 : vector<2x32xf32>
    %5 = arith.divf %3, %4 : vector<2x32xf32>
    %6 = arith.mulf %0, %5 : vector<2x32xf32>
    %c0_1 = arith.constant 0 : index
    %c0_2 = arith.constant 0 : index
    %7 = vector.load %arg2[%c0_1, %c0_2] : memref<32x64xf32, #tpu.memory_space<vmem>>, vector<32x64xf32>
    %cst_3 = arith.constant dense<0.000000e+00> : vector<2x64xf32>
    %8 = tpu.matmul %6, %7, %cst_3 {dimension_numbers = #tpu.dot_dimension_numbers<[1], [0], [0], [1], [0, 0, 1, 1], [], []>} : vector<2x32xf32>, vector<32x64xf32>, vector<2x64xf32> -> vector<2x64xf32>
    %c0_4 = arith.constant 0 : index
    %c0_5 = arith.constant 0 : index
    %9 = vector.load %arg3[%c0_4, %c0_5] : memref<1x64xf32, #tpu.memory_space<vmem>>, vector<1x64xf32>
    %10 = vector.broadcast %9 : vector<1x64xf32> to vector<2x64xf32>
    %11 = arith.addf %8, %10 : vector<2x64xf32>
    %c0_6 = arith.constant 0 : index
    %c0_7 = arith.constant 0 : index
    %12 = vector.load %arg4[%c0_6, %c0_7] : memref<2x64xf32, #tpu.memory_space<vmem>>, vector<2x64xf32>
    tpu.vector_store %arg4[%c0_6, %c0_7], %11 {strides = array<i32>} : memref<2x64xf32, #tpu.memory_space<vmem>>, vector<2x64xf32>,
    return
  }
  func.func @transform_0(%arg0: i32) -> (i32, i32) {
    %c0_i32 = arith.constant 0 : i32
    %c0_i32_0 = arith.constant 0 : i32
    %c0_i32_1 = arith.constant 0 : i32
    return %c0_i32, %c0_i32_0 : i32, i32
  }
  func.func @transform_1(%arg0: i32) -> (i32, i32) {
    %c0_i32 = arith.constant 0 : i32
    %c0_i32_0 = arith.constant 0 : i32
    return %c0_i32, %arg0 : i32, i32
  }
  func.func @transform_2(%arg0: i32) -> (i32, i32) {
    %c0_i32 = arith.constant 0 : i32
    %c0_i32_0 = arith.constant 0 : i32
    return %c0_i32, %arg0 : i32, i32
  }
  func.func @transform_3(%arg0: i32) -> (i32, i32) {
    %c0_i32 = arith.constant 0 : i32
    %c0_i32_0 = arith.constant 0 : i32
    return %c0_i32, %arg0 : i32, i32
  }
}

</mosaic_0001>

<bundles_post_ra>
// kernel: tpu_custom_call.1
= control target key start
LH: loop header
LB: loop body
LE: loop exit
PB: predicated region body
PF: predicated region fallthrough
CT: control target
= control target key end

     0   :  { %8 = vsyncpa [#allocation3], 0  ;;  %s335_s0 = inlined_call_operand.hbm [shape: f32[2,32], index: 0, kind: input, shape index: {}]   ;;  %s336_s1 = inlined_call_operand.hbm [shape: f32[32,64], index: 1, kind: input, shape index: {}]   ;;  %s337_s2 = inlined_call_operand.vmem [shape: f32[1,64], index: 2, kind: input, shape index: {}]   ;;  %s338_s3 = inlined_call_operand.hbm [shape: f32[2,64], index: 3, kind: output, shape index: {}]  }
   0x1   :  { %9 = vsyncpa [#allocation6], 0 }
   0x2   :  { %10 = vsyncpa [#allocation4], 0  ;;  %s261_s12 = smov [#allocation2]   ;;  %s262_s14 = smov [#allocation5]  }
   0x3   :  { %s17_s13 = sshll.u32 %s261_s12, 4  ;;  %s26_s15 = sshll.u32 %s262_s14, 4  ;;  %s18_s13 = int_to_ptr.vmem [resolvable:$true] %s17_s13  ;;  %s289_s15 = int_to_ptr.vmem [resolvable:$true] %s26_s15 }
   0x4   :  { %s189_s18 = scalar_lea.hbm %s335_s0, 32 }
   0x5   :  { %p190_p0 = scmp.ne.s32.totalorder %s335_s0, %s189_s18  ;;  %p193_p1 = scmp.lt.u32.totalorder %s189_s18, %s335_s0 }
   0x7   :  { %p195_p2 = pnand %p193_p1, %p190_p0 }
   0x9   :  { %198 = shalt.err (!%p195_p2)
}
   0xa   :  { %s199_s23 = scalar_lea.vmem %s18_s13, 32  ;;  %p204_p4 = scmp.lt.s32.totalorder %s18_s13, %s18_s13 }
   0xb   :  { %p200_p3 = scmp.ne.s32.totalorder %s18_s13, %s199_s23  ;;  %p205_p5 = scmp.lt.s32.totalorder %s199_s23, %s199_s23 }
   0xd   :  { %p206_p6 = por %p205_p5, %p204_p4 }
   0xf   :  { %p207_p7 = pnand %p206_p6, %p200_p3 }
  0x11   :  { %210 = shalt.err (!%p207_p7)
}
  0x12   :  { %20 = dma.hbm_to_vmem [thread:$0]  %s335_s0, 32, %s18_s13, [#allocation3]  }
  0x13   :  { %s211_s28 = scalar_lea.hbm %s336_s1, 512 }
  0x14   :  { %p212_p8 = scmp.ne.s32.totalorder %s336_s1, %s211_s28  ;;  %p215_p9 = scmp.lt.u32.totalorder %s211_s28, %s336_s1 }
  0x16   :  { %p217_p10 = pnand %p215_p9, %p212_p8 }
  0x18   :  { %220 = shalt.err (!%p217_p10)
}
  0x19   :  { %s221_s6 = scalar_lea.vmem %s289_s15, 512  ;;  %p226_p12 = scmp.lt.s32.totalorder %s289_s15, %s289_s15 }
  0x1a   :  { %p222_p11 = scmp.ne.s32.totalorder %s289_s15, %s221_s6  ;;  %p227_p13 = scmp.lt.s32.totalorder %s221_s6, %s221_s6 }
  0x1c   :  { %p228_p0 = por %p227_p13, %p226_p12 }
  0x1e   :  { %p229_p1 = pnand %p228_p0, %p222_p11 }
  0x20   :  { %232 = shalt.err (!%p229_p1)
}
  0x21   :  { %s263_s0 = smov 128   ;;  %s264_s7 = smov 8  }
  0x22   :  { %32 = dma.hbm_to_vmem [thread:$0]  %s336_s1, 512, %s289_s15, [#allocation6], %s263_s0, %s263_s0, %s264_s7  }
  0x23   :  { %255 = dma.done.wait [#allocation3], 32  }
  0x24   :  { %256 = vsyncadd [#allocation3], 4294967264 }
  0x25   :  { %257 = dma.done.wait [#allocation6], 512  }
  0x26   :  { %258 = vsyncadd [#allocation6], 4294966784  ;;  %v265_v0 = vmov 0.0|0.0   ;;  %vm266_vm0 = vmmov 0   ;;  %v267_v1 = vmov 0.0   ;;  %v49_v2 = vld [vmem:[#allocation5] sm:$0xff] }
  0x27   :  { %171 = vmatprep.subr.bf16.mxu0 %v265_v0  ;;  %168 = vmatprep.mubr.msk.f32.mxu0 %vm266_vm0, %v267_v1  ;;  %v50_v3 = vld [vmem:[#allocation5 + $0x8] sm:$0xff]  ;;  %v51_v4 = vld [vmem:[#allocation5 + $0x10] sm:$0xff]  ;;  %v52_v6 = vld [vmem:[#allocation5 + $0x18] sm:$0xff]  ;;  %vm60_vm1 = vcmask 261120   ;;  %s268_s11 = smov [#allocation7]   ;;  %vm134_vm2 = vcmask 517120  }
  0x28   :  { %v172_v5 = vpack.c.bf16 %v50_v3, %v49_v2  ;;  %v41_v7 = vld [vmem:[#allocation2] sm:$0x3]  ;;  %v175_v9 = vpack.c.bf16 %v52_v6, %v51_v4  ;;  %s142_s12 = sshll.u32 %s268_s11, 4  ;;  %s143_s12 = int_to_ptr.vmem [resolvable:$true] %s142_s12 }
  0x29   :  { %v152_v8 = vmul.f32 -1.442695, %v41_v7  ;;  %v153_v14 = vld [vmem:[%s337_s2] ss:$0 sm:$0xff]  ;;  %s233_s13 = scalar_lea.vmem %s143_s12, 32  ;;  %p238_p3 = scmp.lt.s32.totalorder %s143_s12, %s143_s12 }
  0x2a   :  { %173 = vmatpush3.bf16.msra.mxu0 %v172_v5  ;;  %p234_p2 = scmp.ne.s32.totalorder %s143_s12, %s233_s13  ;;  %p239_p4 = scmp.lt.s32.totalorder %s233_s13, %s233_s13 }
  0x2b   :  { %174 = vmatprep.subr.bf16.mxu0 %v265_v0  ;;  %185 = vpow2.f32 %v152_v8 }
  0x2c   :  { %p240_p5 = por %p239_p4, %p238_p3 }
  0x2e   :  { %176 = vmatpush3.bf16.msra.mxu0 %v175_v9  ;;  %p241_p6 = pnand %p240_p5, %p234_p2 }
  0x35   :  { %v186_v10 = vpop.eup %185 }
  0x36   :  { %v45_v11 = vadd.f32 1.0, %v186_v10 }
  0x38   :  { %187 = vrcp.f32 %v45_v11 }
  0x42   :  { %v188_v12 = vpop.eup %187 }
  0x43   :  { %v48_v13 = vmul.f32 %v188_v12, %v41_v7 }
  0x45   :  { %169 = vmatmul.mubr.msk.f32.vlgmr.msra.gmra.mrb[0].mxu0 %vm60_vm1, %v48_v13 }
 0x118   :  { %v130_v15 = vpop.f32.mrb[0].mxu0 }
 0x119   :  { %v131_v16 = vadd.f32 %v153_v14, %v130_v15  ;;  %v170_v17 = vpop.f32.mrb[1].mxu0 }
 0x11b   :  { %135 = vst.msk [vmem:[#allocation7] sm:$0x3] %vm134_vm2, %v131_v16 }
 0x11c   :  { %244 = shalt.err (!%p241_p6)
}
 0x11d   :  { %s245_s16 = scalar_lea.hbm %s338_s3, 32 }
 0x11e   :  { %p246_p7 = scmp.ne.s32.totalorder %s338_s3, %s245_s16  ;;  %p249_p8 = scmp.lt.u32.totalorder %s245_s16, %s338_s3 }
 0x120   :  { %p251_p9 = pnand %p249_p8, %p246_p7 }
 0x122   :  { %254 = shalt.err (!%p251_p9)
}
 0x123   :  { %145 = dma.vmem_to_hbm [thread:$0]  %s143_s12, 32, %s338_s3, [#allocation4]  }
 0x124   :  { %259 = dma.done.wait [#allocation4], 32  }
 0x125   :  { %260 = vsyncadd [#allocation4], 4294967264 }
 0x126   :  { %149 = vsyncpa [#allocation3], 1 }
 0x127   :  { %150 = vsyncpa [#allocation6], 1 }
 0x128   :  { %151 = vsyncpa [#allocation4], 1 }

</bundles_post_ra>
